<compile_context>
chip_gen: v5e
topology: v5e:2x2
jax: 0.10.0
libtpu: 0.0.40
codegen_flags: <defaults>
</compile_context>

<pallas_src>
import jax
import jax.numpy as jnp
from jax.experimental import pallas as pl
from jax.experimental.pallas import tpu as pltpu


# ---------------------------------------------------------------------------
# Stage 1: KernelAttention
# ---------------------------------------------------------------------------
def _kernel_attention_kernel(x_ref, z_ref, w1z_ref, w1x_ref, shift_ref, w2_ref,
                             o_ref, acc_ref):
    s = pl.program_id(1)                      # HW (reduction) grid axis, last

    @pl.when(s == 0)
    def _init():
        acc_ref[...] = jnp.zeros_like(acc_ref)

    # Partial pooled sum; HW is on the dense lane axis.  Accumulate in f32.
    acc_ref[...] += jnp.sum(x_ref[...].astype(jnp.float32), axis=-1)   # [tb, C]

    @pl.when(s == pl.num_programs(1) - 1)
    def _finalize():
        z = z_ref[...][:, 0, :]                                        # [tb, T]
        # net1 with BN scale and 1/HW folded into the weight columns.
        h = jnp.dot(z, w1z_ref[...], preferred_element_type=jnp.float32)
        h += jnp.dot(acc_ref[...], w1x_ref[...],
                     preferred_element_type=jnp.float32)
        h = jnp.maximum(h + shift_ref[...], 0.0)                       # BN shift + ReLU
        # net2 with 1/temperature folded in, then sigmoid.
        logits = jnp.dot(h, w2_ref[...], preferred_element_type=jnp.float32)
        o_ref[...] = jax.nn.sigmoid(logits)[:, None, :].astype(o_ref.dtype)


def _pick_hw_tile(hw, row_bytes, max_block_bytes=4 << 20):
    """Largest multiple of 128 that exactly divides hw and fits the budget."""
    if hw % 128 != 0:
        return hw                                   # single full block (legal)
    best = 128
    for t in range(128, hw + 1, 128):
        if hw % t == 0 and t * row_bytes <= max_block_bytes:
            best = t
    return best


def kernel_attention(x_nchw, z, w1, bn_gamma, bn_beta, bn_mean, bn_var, w2,
                     *, temperature=1.0, eps=1e-5, hw_tile=None):
    """KernelAttention forward.  x_nchw: [B, C, H, W], z: [B, T] -> [B, K]."""
    B, C, H, W = x_nchw.shape
    T = w1.shape[0]
    K = w2.shape[0]
    HW = H * W

    # --- layout: free reshapes of contiguous NCHW (no transpose) ---
    x3 = x_nchw.reshape(B, C, HW)
    z3 = z.reshape(B, 1, T)

    # --- parameter folding (eval-mode BN, 1/HW, 1/temperature) ---
    w1_2d = w1.reshape(T, T + C).astype(jnp.float32)
    inv_std = 1.0 / jnp.sqrt(bn_var.astype(jnp.float32) + eps)
    scale = bn_gamma.astype(jnp.float32) * inv_std                          # [T]
    shift = (bn_beta.astype(jnp.float32)
             - bn_mean.astype(jnp.float32) * scale).reshape(1, T)
    w1z_s = jnp.transpose(w1_2d[:, :T]) * scale[None, :]                    # [T, T]
    w1x_s = (jnp.transpose(w1_2d[:, T:]) * scale[None, :]) / float(HW)      # [C, T]
    w2_s = jnp.transpose(w2.reshape(K, T).astype(jnp.float32)) / float(temperature)

    tb = 1
    if hw_tile is None:
        hw_tile = _pick_hw_tile(HW, tb * C * x3.dtype.itemsize)
    assert HW % hw_tile == 0
    grid = (B // tb, HW // hw_tile)

    out3 = pl.pallas_call(
        _kernel_attention_kernel,
        out_shape=jax.ShapeDtypeStruct((B, 1, K), jnp.float32),
        grid=grid,
        in_specs=[
            pl.BlockSpec((tb, C, hw_tile), lambda b, s: (b, 0, s)),   # x
            pl.BlockSpec((tb, 1, T), lambda b, s: (b, 0, 0)),         # z
            pl.BlockSpec((T, T), lambda b, s: (0, 0)),                # W1z'
            pl.BlockSpec((C, T), lambda b, s: (0, 0)),                # W1x'
            pl.BlockSpec((1, T), lambda b, s: (0, 0)),                # BN shift
            pl.BlockSpec((T, K), lambda b, s: (0, 0)),                # W2'
        ],
        out_specs=pl.BlockSpec((tb, 1, K), lambda b, s: (b, 0, 0)),
        scratch_shapes=[pltpu.VMEM((tb, C), jnp.float32)],
        compiler_params=pltpu.CompilerParams(
            dimension_semantics=("parallel", "arbitrary"),
            vmem_limit_bytes=32 * 1024 * 1024),
    )(x3, z3, w1z_s, w1x_s, shift, w2_s)
    return out3.reshape(B, K)


# ---------------------------------------------------------------------------
# Stage 2: per-sample dynamic convolution (weight aggregation + conv-as-matmul)
# ---------------------------------------------------------------------------
def _cond_conv_kernel(att_ref, patches_ref, wbank_ref, wstatic_ref, o_ref):
    b = pl.program_id(0)
    # Per-sample weight: W_b = static + sum_k att[b, k] * bank_k   (K small, static)
    w = wstatic_ref[...]                                        # [Co, Ci*kk]
    for k in range(wbank_ref.shape[0]):
        w = w + att_ref[b, k] * wbank_ref[k]
    # Conv == matmul over im2col patches: [Co, Ci*kk] @ [Ci*kk, Ho*Wo]
    o_ref[0] = jnp.dot(w, patches_ref[0],
                       preferred_element_type=jnp.float32).astype(o_ref.dtype)


def cond_conv_dynamic(x_nchw, att, weight_bank, static_weight, *,
                      stride=1, padding=1, dilation=1):
    """x: [B, Ci, H, W], att: [B, K] -> [B, Co, Ho, Wo]."""
    B, Ci, H, W = x_nchw.shape
    K, Co, Ci2, kh, kw = weight_bank.shape
    assert Ci2 == Ci          # TODO(synk): groups > 1 (grouped CondConv) not implemented
    # TODO(synk): bias=True path (aggregate_bias) not implemented; module default is bias=False
    kk = kh * kw

    Ho = (H + 2 * padding - dilation * (kh - 1) - 1) // stride + 1
    Wo = (W + 2 * padding - dilation * (kw - 1) - 1) // stride + 1

    # im2col patch extraction (plain-JAX layout glue; contiguous slices of NCHW).
    xp = jnp.pad(x_nchw, ((0, 0), (0, 0), (padding, padding), (padding, padding)))
    cols = []
    for i in range(kh):
        for j in range(kw):
            hi, wi = i * dilation, j * dilation
            cols.append(xp[:, :, hi:hi + (Ho - 1) * stride + 1:stride,
                               wi:wi + (Wo - 1) * stride + 1:stride])
    patches = jnp.stack(cols, axis=2).reshape(B, Ci * kk, Ho * Wo).astype(jnp.float32)

    wbank = (weight_bank.reshape(K, Co, Ci * kk) * 0.1).astype(jnp.float32)
    wstatic = static_weight.reshape(Co, Ci * kk).astype(jnp.float32)

    out = pl.pallas_call(
        _cond_conv_kernel,
        out_shape=jax.ShapeDtypeStruct((B, Co, Ho * Wo), jnp.float32),
        grid=(B,),
        in_specs=[
            pl.BlockSpec(memory_space=pltpu.MemorySpace.SMEM),            # att [B, K]
            pl.BlockSpec((1, Ci * kk, Ho * Wo), lambda b: (b, 0, 0)),     # patches
            pl.BlockSpec((K, Co, Ci * kk), lambda b: (0, 0, 0)),          # weight bank
            pl.BlockSpec((Co, Ci * kk), lambda b: (0, 0)),                # static weight
        ],
        out_specs=pl.BlockSpec((1, Co, Ho * Wo), lambda b: (b, 0, 0)),
        compiler_params=pltpu.CompilerParams(
            dimension_semantics=("parallel",),
            vmem_limit_bytes=32 * 1024 * 1024),
    )(att.astype(jnp.float32), patches, wbank, wstatic)
    return out.reshape(B, Co, Ho, Wo)


def cond_conv_forward(x, z, p, *, temperature=1.0, eps=1e-5,
                      stride=1, padding=1, dilation=1, hw_tile=None):
    att = kernel_attention(x, z, p["w1"], p["bn_gamma"], p["bn_beta"],
                           p["bn_mean"], p["bn_var"], p["w2"],
                           temperature=temperature, eps=eps, hw_tile=hw_tile)
    out = cond_conv_dynamic(x, att, p["weight"], p["static_weight"],
                            stride=stride, padding=padding, dilation=dilation)
    return out, att


# ---------------------------------------------------------------------------
# Plain-JAX reference (mirrors the PyTorch forward, eval-mode BN)
# ---------------------------------------------------------------------------
def _reference_forward(x, z, p, *, temperature=1.0, eps=1e-5,
                       stride=1, padding=1, dilation=1):
    hi = jax.lax.Precision.HIGHEST
    B, Ci, H, W = x.shape
    T = p["w1"].shape[0]
    K = p["w2"].shape[0]
    Co, _, kh, kw = p["static_weight"].shape

    pooled = jnp.mean(x, axis=(2, 3))
    v = jnp.concatenate([z, pooled], axis=1)
    h = jnp.dot(v, p["w1"].reshape(T, T + Ci).T, precision=hi)
    h = (h - p["bn_mean"]) / jnp.sqrt(p["bn_var"] + eps) * p["bn_gamma"] + p["bn_beta"]
    h = jnp.maximum(h, 0.0)
    att = jax.nn.sigmoid(jnp.dot(h, p["w2"].reshape(K, T).T, precision=hi) / temperature)

    wflat = p["weight"].reshape(K, -1) * 0.1
    aggw = (jnp.dot(att, wflat, precision=hi).reshape(B, Co, Ci, kh, kw)
            + p["static_weight"][None])

    xg = x.reshape(1, B * Ci, H, W)
    wg = aggw.reshape(B * Co, Ci, kh, kw)
    out = jax.lax.conv_general_dilated(
        xg, wg, window_strides=(stride, stride),
        padding=((padding, padding), (padding, padding)),
        rhs_dilation=(dilation, dilation),
        dimension_numbers=("NCHW", "OIHW", "NCHW"),
        feature_group_count=B, precision=hi)
    return out.reshape(B, Co, out.shape[2], out.shape[3]), att


if __name__ == "__main__":
    B, C, H, W = 2, 4, 16, 16        # batch, in_channels, spatial
    T = 32                           # token_dims
    K = 4                            # number of dynamic kernels
    Co = 8                           # out_channels

    key = jax.random.PRNGKey(0)
    ks = jax.random.split(key, 10)

    x = jax.random.normal(ks[0], (B, C, H, W), dtype=jnp.float32)
    z = jax.random.normal(ks[1], (B, T), dtype=jnp.float32)

    params = dict(
        w1=0.1 * jax.random.normal(ks[2], (T, T + C, 1, 1), dtype=jnp.float32),
        w2=0.1 * jax.random.normal(ks[3], (K, T, 1, 1), dtype=jnp.float32),
        bn_gamma=1.0 + 0.1 * jax.random.normal(ks[4], (T,), dtype=jnp.float32),
        bn_beta=0.1 * jax.random.normal(ks[5], (T,), dtype=jnp.float32),
        bn_mean=0.1 * jax.random.normal(ks[6], (T,), dtype=jnp.float32),
        bn_var=jnp.abs(jax.random.normal(ks[7], (T,), dtype=jnp.float32)) + 0.5,
        # Module initializes `weight` to zeros; random here (as if trained) so the
        # dynamic-aggregation path is actually exercised.
        weight=0.5 * jax.random.normal(ks[8], (K, Co, C, 3, 3), dtype=jnp.float32),
        static_weight=(jnp.sqrt(2.0 / (C * 9)) *
                       jax.random.normal(ks[9], (Co, C, 3, 3), dtype=jnp.float32)),
    )
    temperature = 2.0

    # hw_tile=128 -> two HW grid steps, exercising the pooled-sum accumulator.
    out, att = cond_conv_forward(x, z, params, temperature=temperature, hw_tile=128)
    out = jax.block_until_ready(out)

    ref_out, ref_att = _reference_forward(x, z, params, temperature=temperature)

    assert att.shape == (B, K)
    assert out.shape == (B, Co, H, W)
    assert jnp.allclose(att, ref_att, atol=1e-4, rtol=1e-4), (att, ref_att)
    assert jnp.allclose(out, ref_out, atol=1e-3, rtol=1e-3), float(
        jnp.max(jnp.abs(out - ref_out)))
    print("KERNEL_OK")
</pallas_src>

<mosaic_0001>
module attributes {stable_mosaic.version = 11 : i64} {
  func.func @_kernel_attention_kernel(%arg0: i32, %arg1: i32, %arg2: memref<1x4x128xf32, #tpu.memory_space<vmem>>, %arg3: memref<1x1x32xf32, #tpu.memory_space<vmem>>, %arg4: memref<32x32xf32, #tpu.memory_space<vmem>>, %arg5: memref<4x32xf32, #tpu.memory_space<vmem>>, %arg6: memref<1x32xf32, #tpu.memory_space<vmem>>, %arg7: memref<32x4xf32, #tpu.memory_space<vmem>>, %arg8: memref<1x1x4xf32, #tpu.memory_space<vmem>>, %arg9: memref<1x4xf32, #tpu.memory_space<vmem>>) attributes {dimension_semantics = [#tpu.dimension_semantics<parallel>, #tpu.dimension_semantics<arbitrary>], iteration_bounds = array<i64: 2, 2>, scalar_prefetch = 0 : i64, scratch_operands = 1 : i64, tpu.core_type = #tpu.core_type<tc>, window_params = [{transform_indices = @transform_0, window_bounds = array<i64: 1, 4, 128>}, {transform_indices = @transform_1, window_bounds = array<i64: 1, 1, 32>}, {pipeline_mode = #tpu.pipeline_mode<synchronous>, transform_indices = @transform_2, window_bounds = array<i64: 32, 32>}, {pipeline_mode = #tpu.pipeline_mode<synchronous>, transform_indices = @transform_3, window_bounds = array<i64: 4, 32>}, {pipeline_mode = #tpu.pipeline_mode<synchronous>, transform_indices = @transform_4, window_bounds = array<i64: 1, 32>}, {pipeline_mode = #tpu.pipeline_mode<synchronous>, transform_indices = @transform_5, window_bounds = array<i64: 32, 4>}, {transform_indices = @transform_6, window_bounds = array<i64: 1, 1, 4>}]} {
    %c0_i32 = arith.constant 0 : i32
    %0 = arith.cmpi eq, %arg1, %c0_i32 : i32
    %1 = arith.extui %0 : i1 to i32
    %c0_i32_0 = arith.constant 0 : i32
    %2 = arith.cmpi ne, %1, %c0_i32_0 : i32
    scf.if %2 {
      %cst_8 = arith.constant 0.000000e+00 : f32
      %11 = vector.broadcast %cst_8 : f32 to vector<1x4xf32>
      %c0_9 = arith.constant 0 : index
      %c0_10 = arith.constant 0 : index
      %12 = vector.load %arg9[%c0_9, %c0_10] : memref<1x4xf32, #tpu.memory_space<vmem>>, vector<1x4xf32>
      tpu.vector_store %arg9[%c0_9, %c0_10], %11 {strides = array<i32>} : memref<1x4xf32, #tpu.memory_space<vmem>>, vector<1x4xf32>,
    } else {
    }
    %c0 = arith.constant 0 : index
    %c0_1 = arith.constant 0 : index
    %3 = vector.load %arg9[%c0, %c0_1] : memref<1x4xf32, #tpu.memory_space<vmem>>, vector<1x4xf32>
    %c0_2 = arith.constant 0 : index
    %c0_3 = arith.constant 0 : index
    %c0_4 = arith.constant 0 : index
    %4 = vector.load %arg2[%c0_2, %c0_3, %c0_4] : memref<1x4x128xf32, #tpu.memory_space<vmem>>, vector<1x4x128xf32>
    %cst = arith.constant dense<0.000000e+00> : vector<1x4xf32>
    %5 = vector.multi_reduction <add>, %4, %cst [2] : vector<1x4x128xf32> to vector<1x4xf32>
    %6 = arith.addf %3, %5 : vector<1x4xf32>
    %c0_5 = arith.constant 0 : index
    %c0_6 = arith.constant 0 : index
    %7 = vector.load %arg9[%c0_5, %c0_6] : memref<1x4xf32, #tpu.memory_space<vmem>>, vector<1x4xf32>
    tpu.vector_store %arg9[%c0_5, %c0_6], %6 {strides = array<i32>} : memref<1x4xf32, #tpu.memory_space<vmem>>, vector<1x4xf32>,
    %c1_i32 = arith.constant 1 : i32
    %8 = arith.cmpi eq, %arg1, %c1_i32 : i32
    %9 = arith.extui %8 : i1 to i32
    %c0_i32_7 = arith.constant 0 : i32
    %10 = arith.cmpi ne, %9, %c0_i32_7 : i32
    scf.if %10 {
      %c0_8 = arith.constant 0 : index
      %c0_9 = arith.constant 0 : index
      %c0_10 = arith.constant 0 : index
      %11 = vector.load %arg3[%c0_8, %c0_9, %c0_10] : memref<1x1x32xf32, #tpu.memory_space<vmem>>, vector<1x1x32xf32>
      %12 = vector.shape_cast %11 : vector<1x1x32xf32> to vector<1x32xf32>
      %c0_11 = arith.constant 0 : index
      %c0_12 = arith.constant 0 : index
      %13 = vector.load %arg4[%c0_11, %c0_12] : memref<32x32xf32, #tpu.memory_space<vmem>>, vector<32x32xf32>
      %cst_13 = arith.constant dense<0.000000e+00> : vector<1x32xf32>
      %14 = tpu.matmul %12, %13, %cst_13 {dimension_numbers = #tpu.dot_dimension_numbers<[1], [0], [0], [1], [0, 0, 1, 1], [], []>} : vector<1x32xf32>, vector<32x32xf32>, vector<1x32xf32> -> vector<1x32xf32>
      %c0_14 = arith.constant 0 : index
      %c0_15 = arith.constant 0 : index
      %15 = vector.load %arg9[%c0_14, %c0_15] : memref<1x4xf32, #tpu.memory_space<vmem>>, vector<1x4xf32>
      %c0_16 = arith.constant 0 : index
      %c0_17 = arith.constant 0 : index
      %16 = vector.load %arg5[%c0_16, %c0_17] : memref<4x32xf32, #tpu.memory_space<vmem>>, vector<4x32xf32>
      %cst_18 = arith.constant dense<0.000000e+00> : vector<1x32xf32>
      %17 = tpu.matmul %15, %16, %cst_18 {dimension_numbers = #tpu.dot_dimension_numbers<[1], [0], [0], [1], [0, 0, 1, 1], [], []>} : vector<1x4xf32>, vector<4x32xf32>, vector<1x32xf32> -> vector<1x32xf32>
      %18 = arith.addf %14, %17 : vector<1x32xf32>
      %c0_19 = arith.constant 0 : index
      %c0_20 = arith.constant 0 : index
      %19 = vector.load %arg6[%c0_19, %c0_20] : memref<1x32xf32, #tpu.memory_space<vmem>>, vector<1x32xf32>
      %20 = arith.addf %18, %19 : vector<1x32xf32>
      %cst_21 = arith.constant 0.000000e+00 : f32
      %21 = vector.broadcast %cst_21 : f32 to vector<1x32xf32>
      %22 = arith.maximumf %20, %21 : vector<1x32xf32>
      %c0_22 = arith.constant 0 : index
      %c0_23 = arith.constant 0 : index
      %23 = vector.load %arg7[%c0_22, %c0_23] : memref<32x4xf32, #tpu.memory_space<vmem>>, vector<32x4xf32>
      %cst_24 = arith.constant dense<0.000000e+00> : vector<1x4xf32>
      %24 = tpu.matmul %22, %23, %cst_24 {dimension_numbers = #tpu.dot_dimension_numbers<[1], [0], [0], [1], [0, 0, 1, 1], [], []>} : vector<1x32xf32>, vector<32x4xf32>, vector<1x4xf32> -> vector<1x4xf32>
      %25 = arith.negf %24 : vector<1x4xf32>
      %26 = math.exp %25 : vector<1x4xf32>
      %cst_25 = arith.constant 1.000000e+00 : f32
      %27 = vector.broadcast %cst_25 : f32 to vector<1x4xf32>
      %28 = arith.addf %27, %26 : vector<1x4xf32>
      %29 = arith.divf %27, %28 : vector<1x4xf32>
      %30 = vector.shape_cast %29 : vector<1x4xf32> to vector<1x1x4xf32>
      %c0_26 = arith.constant 0 : index
      %c0_27 = arith.constant 0 : index
      %c0_28 = arith.constant 0 : index
      %31 = vector.load %arg8[%c0_26, %c0_27, %c0_28] : memref<1x1x4xf32, #tpu.memory_space<vmem>>, vector<1x1x4xf32>
      tpu.vector_store %arg8[%c0_26, %c0_27, %c0_28], %30 {strides = array<i32>} : memref<1x1x4xf32, #tpu.memory_space<vmem>>, vector<1x1x4xf32>,
    } else {
    }
    return
  }
  func.func @transform_0(%arg0: i32, %arg1: i32) -> (i32, i32, i32) {
    %c0_i32 = arith.constant 0 : i32
    %c0_i32_0 = arith.constant 0 : i32
    return %arg0, %c0_i32, %arg1 : i32, i32, i32
  }
  func.func @transform_1(%arg0: i32, %arg1: i32) -> (i32, i32, i32) {
    %c0_i32 = arith.constant 0 : i32
    %c0_i32_0 = arith.constant 0 : i32
    %c0_i32_1 = arith.constant 0 : i32
    return %arg0, %c0_i32, %c0_i32_0 : i32, i32, i32
  }
  func.func @transform_2(%arg0: i32, %arg1: i32) -> (i32, i32) {
    %c0_i32 = arith.constant 0 : i32
    %c0_i32_0 = arith.constant 0 : i32
    %c0_i32_1 = arith.constant 0 : i32
    return %c0_i32, %c0_i32_0 : i32, i32
  }
  func.func @transform_3(%arg0: i32, %arg1: i32) -> (i32, i32) {
    %c0_i32 = arith.constant 0 : i32
    %c0_i32_0 = arith.constant 0 : i32
    %c0_i32_1 = arith.constant 0 : i32
    return %c0_i32, %c0_i32_0 : i32, i32
  }
  func.func @transform_4(%arg0: i32, %arg1: i32) -> (i32, i32) {
    %c0_i32 = arith.constant 0 : i32
    %c0_i32_0 = arith.constant 0 : i32
    %c0_i32_1 = arith.constant 0 : i32
    return %c0_i32, %c0_i32_0 : i32, i32
  }
  func.func @transform_5(%arg0: i32, %arg1: i32) -> (i32, i32) {
    %c0_i32 = arith.constant 0 : i32
    %c0_i32_0 = arith.constant 0 : i32
    %c0_i32_1 = arith.constant 0 : i32
    return %c0_i32, %c0_i32_0 : i32, i32
  }
  func.func @transform_6(%arg0: i32, %arg1: i32) -> (i32, i32, i32) {
    %c0_i32 = arith.constant 0 : i32
    %c0_i32_0 = arith.constant 0 : i32
    %c0_i32_1 = arith.constant 0 : i32
    return %arg0, %c0_i32, %c0_i32_0 : i32, i32, i32
  }
}

</mosaic_0001>

<bundles_post_ra>
// kernel: tpu_custom_call.1
= control target key start
LH: loop header
LB: loop body
LE: loop exit
PB: predicated region body
PF: predicated region fallthrough
CT: control target
= control target key end

     0   :  { %s1271_s0 = inlined_call_operand.hbm [shape: f32[2,4,256], index: 0, kind: input, shape index: {}]   ;;  %s1272_s1 = inlined_call_operand.hbm [shape: f32[2,1,32], index: 1, kind: input, shape index: {}]   ;;  %s1273_s2 = inlined_call_operand.vmem [shape: f32[32,32], index: 2, kind: input, shape index: {}]   ;;  %s1274_s3 = inlined_call_operand.vmem [shape: f32[4,32], index: 3, kind: input, shape index: {}]   ;;  %s1275_s4 = inlined_call_operand.hbm [shape: f32[1,32], index: 4, kind: input, shape index: {}]   ;;  %s1276_s5 = inlined_call_operand.vmem [shape: f32[32,4], index: 5, kind: input, shape index: {}]   ;;  %s1277_s6 = inlined_call_operand.hbm [shape: f32[2,1,4], index: 6, kind: output, shape index: {}]  }
   0x1   :  { %1284 = sst [smem:[#allocation19_spill]] %s1271_s0 }
   0x2   :  { %1285 = sst [smem:[#allocation20_spill]] %s1275_s4 }
   0x3   :  { %1286 = sst [smem:[#allocation21_spill]] %s1276_s5 }
   0x4   :  { %1287 = sst [smem:[#allocation22_spill]] %s1277_s6 }
   0x5   :  { %11 = vsyncpa [#allocation4], 0 }
   0x6   :  { %13 = vsyncpa [#allocation4 + $0x1], 0 }
   0x7   :  { %14 = vsyncpa [#allocation7], 0 }
   0x8   :  { %16 = vsyncpa [#allocation7 + $0x1], 0 }
   0x9   :  { %17 = vsyncpa [#allocation5], 0 }
   0xa   :  { %19 = vsyncpa [#allocation5 + $0x1], 0  ;;  %s1005_s21 = smov 0   ;;  %s1007_s22 = smov 0  }
   0xb   :  { %s1009_s23 = smov 0   ;;  %s1011_s24 = smov 0  }
   0xc   :  { %s1013_s25 = smov 0   ;;  %s1015_s26 = smov 0  }
   0xd   :  { %s1017_s27 = smov 0   ;;  %s1019_s28 = smov 0  }
   0xe   :  { %s1021_s29 = smov 0   ;;  %s1023_s30 = smov 0  }
   0xf   :  { %s1025_s7 = smov 0  }
  0x10 LB: > { %1288 = sst [smem:[#allocation14_spill]] %s925_s21  ;;  %s1061_s8 = sadd.s32 4294967295, %s965_s7   ;;  %s965_s7 = sphi %s1025_s7, %s25_s7   ;;  %s961_s30 = sphi %s1023_s30, %s1317_s30   ;;  %s957_s29 = sphi %s1021_s29, %s1316_s29   ;;  %s953_s28 = sphi %s1019_s28, %s1315_s28   ;;  %s949_s27 = sphi %s1017_s27, %s1314_s27   ;;  %s945_s26 = sphi %s1015_s26, %s1313_s26   ;;  %s941_s25 = sphi %s1013_s25, %s1312_s25   ;;  %s937_s24 = sphi %s1011_s24, %s1311_s24   ;;  %s933_s23 = sphi %s1009_s23, %s1310_s23   ;;  %s929_s22 = sphi %s1007_s22, %s1309_s22   ;;  %s925_s21 = sphi %s1005_s21, %s1308_s21  }
  0x11   : > { %1289 = sst [smem:[#allocation15_spill]] %s953_s28  ;;  %s601_s9 = sadd.s32 4294967294, %s965_s7  }
  0x12   : > { %p60_p0 = scmp.eq.s32.totalorder %s1061_s8, 0  ;;  %p85_p1 = scmp.ne.s32.totalorder %s929_s22, %s925_s21 }
  0x13   : > { %p193_p2 = scmp.eq.s32.totalorder %s1061_s8, 3  ;;  %p199_p3 = scmp.eq.s32.totalorder %s601_s9, 3 }
  0x14   : > { %p1070_p4 = por %p85_p1, %p60_p0  ;;  %p602_p5 = scmp.ge.s32.totalorder %s965_s7, 1 }
  0x15   : > { %p1075_p6 = por %p199_p3, %p85_p1  ;;  %p206_p7 = scmp.lt.s32.totalorder %s965_s7, 5 }
  0x16   : > { %s1293_s4 = sld [smem:[#allocation20_spill]]  ;;  %s967_s16 = smov [#allocation8]  }
  0x17   : > { %s1291_s11 = scalar_select %p1075_p6, 1, 0 }
  0x18   : > { %p1083_p8 = pnand %p602_p5, %p206_p7  ;;  %s226_s17 = sshll.u32 %s967_s16, 4  ;;  %s227_s17 = int_to_ptr.vmem [resolvable:$true] %s226_s17 }
  0x19   : > { %1292 = sst [smem:[#allocation16_spill]] %s1291_s11  ;;  %s34_s18 = sadd.s32 1, %s957_s29 }
  0x1a   : > { %p630_p9 = pneg %p1083_p8  ;;  %p35_p11 = scmp.ge.s32.totalorder %s34_s18, 2 }
  0x1b   : > { %s37_s19 = sadd.s32 1, %s961_s30  ;;  %s46_s20 = sadd.s32 1, %s945_s26 }
  0x1c   : > { %s224_s14 = sshll.u32 %s1293_s4, 4  ;;  %p631_p10 = pnand %p630_p9, %p60_p0  ;;  %s225_s14 = int_to_ptr.hbm [resolvable:$true] %s224_s14 }
  0x1d   : > { %p53_p12 = scmp.ne.s32.totalorder %s945_s26, %s941_s25  ;;  %s1319_s18 = smov (%p35_p11, %s34_s18), 0 }
  0x1e   : > { %633 = dma.hbm_to_vmem [thread:$0]  (!%p631_p10), %s225_s14, 16, %s227_s17, [#allocation7]  }
  0x1f   : > { %1295 = sst [smem:[#allocation17_spill]] %s1319_s18  ;;  %s1321_s19 = smov (!%p35_p11, %s37_s19), %s961_s30 }
  0x20   : > { %s42_s9 = ssub.s32 %s957_s29, %s1319_s18  ;;  %p54_p13 = scmp.eq.s32.totalorder %s965_s7, 0 }
  0x21   : > { %p39_p1 = scmp.ge.s32.totalorder %s1321_s19, 2  ;;  %p59_p3 = scmp.ne.s32.totalorder %s941_s25, %s937_s24 }
  0x22   : > { %p1106_p5 = por %p54_p13, %p53_p12  ;;  %p646_p7 = scmp.lt.s32.totalorder %s965_s7, 4 }
  0x23   : > { %s1323_s19 = smov (%p39_p1, %s1321_s19), 0  ;;  %p1115_p9 = por %p60_p0, %p59_p3 }
  0x24   : > { %1297 = sst [smem:[#allocation18_spill]] %s1323_s19  ;;  %s240_s14 = sand.u32 1, %s945_s26  }
  0x25   : > { %s41_s16 = ssub.s32 %s961_s30, %s1323_s19  ;;  %s605_s24 = sshll.u32 %s240_s14, 2 }
  0x26   : > { %s43_s17 = sor.u32 %s42_s9, %s41_s16  ;;  %p70_p10 = scmp.eq.s32.totalorder %s41_s16, 0 }
  0x27   : > { %p44_p11 = scmp.eq.s32.totalorder %s43_s17, 0  ;;  %s606_s4 = sshll.u32 %s961_s30, 1 }
  0x28   : > { %s248_s11 = sadd.s32 %s957_s29, %s606_s4  ;;  %s244_s21 = scalar_lea.vmem [#allocation3], %s605_s24 }
  0x29   : > { %s1124_s18 = scalar_select %p44_p11, %s945_s26, %s46_s20  }
  0x2a   : > { %s254_s6 = sshll.u32 %s244_s21, 4  ;;  %s607_s19 = sshll.u32 %s248_s11, 2  ;;  %s255_s6 = int_to_ptr.vmem [resolvable:$true] %s254_s6 }
  0x2b   : > { %s1299_s0 = sld [smem:[#allocation19_spill]]  ;;  %p635_p12 = pnand %p646_p7, %p1106_p5 }
  0x2c   : > { %s241_s20 = scalar_lea.sflag [#allocation4], %s240_s14  ;;  %s72_s4 = sadd.s32 1, %s933_s23 }
  0x2d   : > { %p79_p1 = scmp.ne.s32.totalorder %s933_s23, %s929_s22  ;;  %s261_s28 = sand.u32 1, %s965_s7  }
  0x2e   : > { %s1139_s24 = scalar_select %p70_p10, %s933_s23, %s72_s4  }
  0x2f   : > { %p1143_p3 = por %p193_p2, %p79_p1  ;;  %p81_p11 = por %p79_p1, %p54_p13 }
  0x30   : > { %s263_s11 = sand.u32 1, %s933_s23   ;;  %s267_s9 = scalar_lea.hbm %s1272_s1, %s961_s30 }
  0x31   : > { %s250_s17 = scalar_lea.hbm %s1299_s0, %s607_s19  ;;  %s269_s14 = sshll.u32 %s267_s9, 4  ;;  %s270_s14 = int_to_ptr.hbm [resolvable:$true] %s269_s14 }
  0x32   : > { %s252_s5 = sshll.u32 %s250_s17, 4  ;;  %p638_p5 = pnand %p646_p7, %p81_p11  ;;  %s253_s5 = int_to_ptr.hbm [resolvable:$true] %s252_s5 }
  0x33   : > { %637 = dma.hbm_to_vmem [thread:$0]  (!%p635_p12), %s253_s5, 64, %s255_s6, %s241_s20  }
  0x34   : > { %s264_s5 = scalar_lea.vmem [#allocation6], %s263_s11  ;;  %s262_s16 = scalar_lea.sflag [#allocation7], %s261_s28 }
  0x35   : > { %s271_s6 = sshll.u32 %s264_s5, 4  ;;  %280 = sbr.rel (%p1083_p8) target bundleno = 646 (0x286), region = 44  ;;  %s272_s6 = int_to_ptr.vmem [resolvable:$true] %s271_s6 }
  0x36   : > { %640 = dma.hbm_to_vmem [thread:$0]  (!%p638_p5), %s270_s14, 16, %s272_s6, %s262_s16  }
  0x37   : > { %s282_s17 = sand.u32 (!%p1083_p8), 1, %s941_s25  }
  0x38   : > { %s609_s20 = sshll.u32 (!%p1083_p8), %s282_s17, 2  ;;  %s283_s4 = scalar_lea.sflag (!%p1083_p8), [#allocation4], %s282_s17 }
  0x39   : > { %s286_s0 = scalar_lea.vmem (!%p1083_p8), [#allocation3], %s609_s20 }
  0x3a   : > { %908 = dma.done.wait (%p1115_p9), %s283_s4, 64  }
  0x3b   : > { %910 = vsyncadd (%p1115_p9), %s283_s4, 4294967232  ;;  %s292_s11 = sand.u32 1, %s1061_s8   ;;  %s1166_s28 = sand.u32 1, %s929_s22  }
  0x3c   : > { %s293_s15 = scalar_lea.sflag [#allocation7], %s292_s11  ;;  %s295_s19 = scalar_lea.vmem [#allocation6], %s1166_s28 }
  0x3d   : > { %912 = dma.done.wait (%p1070_p4), %s293_s15, 16  }
  0x3e   : > { %914 = vsyncadd (%p1070_p4), %s293_s15, 4294967280 }
  0x3f   : > { %916 = dma.done.wait (%p60_p0), [#allocation7], 16  }
  0x40   : > { %918 = vsyncadd (%p60_p0), [#allocation7], 4294967280  ;;  %s332_s13 = scalar_lea.vmem [#allocation9], %s1166_s28  ;;  %p611_p2 = scmp.ne.s32.totalorder %s949_s27, 0 }
  0x42   : > { %336 = sbr.rel (%p611_p2) target bundleno = 73 (0x49), region = 60 }
  0x47   : > { %vm337_vm0 = vcmask 24576   ;;  %v968_v0 = vmov 0.0  }
  0x48   : > { %338 = vst.msk [vmem:[#allocation2] sm:$0x1] %vm337_vm0, %v968_v0 }
  0x49 PF: > { %v340_v1 = vld [vmem:[%s286_s0] sm:$0xf]  ;;  %vm341_vm1 = vcmask 1043456   ;;  %v969_v3 = vmov 0   ;;  %v361_v10 = vlaneseq  ;;  %vm366_vm2 = vcmask 24576   ;;  %p612_p0 = scmp.ne.s32.totalorder %s949_s27, 1 }
  0x4a   : > { %v342_v2 = vsel %vm341_vm1, %v340_v1, 0.0  ;;  %740 = vset.pattern.permute.xlu0 %v969_v3  ;;  %s1301_s4 = sld [smem:[#allocation21_spill]] (!%p612_p0) }
  0x4b   : > { %343 = vadd.xlane.f32.xlu0 %v342_v2  ;;  %v362_v11 = vand.u32 127, %v361_v10 }
  0x4f   : > { %v339_v13 = vld [vmem:[#allocation2] sm:$0x1] }
  0xbe   : > { %v344_v4 = vpop.xlane.xlu0 %343 }
  0xbf   : > { %v346_v5 = vperm.slane %v344_v4, 0  ;;  %v347_v6 = vperm.slane %v344_v4, 1  ;;  %v348_v7 = vperm.slane %v344_v4, 2  ;;  %v349_v8 = vperm.slane %v344_v4, 3 }
  0xc1   : > { %350 = vst [vmem:[#allocation1] ss:$9 sm:$0xff] %v346_v5 }
  0xc2   : > { %352 = vst [vmem:[#allocation1 + $0x1] ss:$9 sm:$0xff] %v347_v6 }
  0xc3   : > { %354 = vst [vmem:[#allocation1 + $0x2] ss:$9 sm:$0xff] %v348_v7 }
  0xc4   : > { %356 = vst [vmem:[#allocation1 + $0x3] ss:$9 sm:$0xff] %v349_v8 }
  0xcb   : > { %v357_v9 = vld [vmem:[#allocation1] sm:$0xff] }
  0xcc   : > { %359 = vperm.xlu0 %740, %v357_v9  }
 0x13e   : > { %v360_v12 = vpop.permute.xlu0 %359 }
 0x13f   : > { %v363_v14 = vperm.slane %v360_v12, %v362_v11  ;;  %371 = sbr.rel (%p612_p0) target bundleno = 625 (0x271), region = 64 }
 0x141   : > { %v365_v15 = vadd.f32 %v363_v14, %v339_v13 }
 0x143   : > { %367 = vst.msk [vmem:[#allocation2] sm:$0x1] %vm366_vm2, %v365_v15 }
 0x144   : > { %v376_v16 = vld [vmem:[%s1273_s2 + $0x18] sm:$0xff]  ;;  %v375_v17 = vld [vmem:[%s1273_s2 + $0x10] sm:$0xff]  ;;  %vm379_vm3 = vcmask 31744   ;;  %v378_v18 = vld [vmem:[%s1274_s3] sm:$0xf]  ;;  %vm406_vm4 = vcmask 261120  }
 0x145   : > { %422 = vmatpush.msra.mxu1 %v376_v16  ;;  %v374_v20 = vld [vmem:[%s1273_s2 + $0x8] sm:$0xff]  ;;  %613 = vmatpush.msk.msra.mxu0 %vm341_vm1, %v378_v18  ;;  %v373_v21 = vld [vmem:[%s1273_s2] sm:$0xff]  ;;  %v436_v23 = vld [vmem:[%s1301_s4 + $0x18] sm:$0xff] }
 0x146   : > { %v372_v22 = vld [vmem:[%s295_s19] sm:$0x1]  ;;  %452 = vmatpush.msra.mxu2 %v436_v23  ;;  %v435_v24 = vld [vmem:[%s1301_s4 + $0x10] sm:$0xff]  ;;  %v434_v25 = vld [vmem:[%s1301_s4 + $0x8] sm:$0xff] }
 0x147   : > { %423 = vmatpush.msra.mxu1 %v375_v17  ;;  %v433_v26 = vld [vmem:[%s1301_s4] sm:$0xff]  ;;  %v430_v29 = vld [vmem:[#allocation8] sm:$0x1] }
 0x148   : > { %453 = vmatpush.msra.mxu2 %v435_v24 }
 0x149   : > { %424 = vmatpush.msra.mxu1 %v374_v20 }
 0x14a   : > { %v377_v19 = vld [vmem:[#allocation2] sm:$0x1]  ;;  %454 = vmatpush.msra.mxu2 %v434_v25 }
 0x14b   : > { %614 = vmatmul.msk.f32.vlgmr.msra.gmra.mxu0 %vm379_vm3, %v377_v19  ;;  %425 = vmatpush.msra.mxu1 %v373_v21 }
 0x14c   : > { %615 = vmatmul.msk.f32.vlgmr.msra.gmra.mxu1 %vm406_vm4, %v372_v22  ;;  %455 = vmatpush.msra.mxu2 %v433_v26 }
 0x1c8   : > { %v403_v27 = vpop.f32.mrf.mxu0 }
 0x1c9   : > { %v427_v28 = vpop.f32.mrf.mxu1 }
 0x1ca   : > { %v428_v30 = vadd.f32 %v427_v28, %v403_v27 }
 0x1cc   : > { %v431_v31 = vadd.f32 %v430_v29, %v428_v30 }
 0x1ce   : > { %v432_v32 = vmax.f32 %v431_v31, 0.0 }
 0x1d0   : > { %616 = vmatmul.msk.f32.vlgmr.msra.gmra.mxu2 %vm406_vm4, %v432_v32 }
 0x253   : > { %v457_v33 = vpop.f32.mrf.mxu2 }
 0x254   : > { %v617_v34 = vmul.f32 -1.442695, %v457_v33 }
 0x256   : > { %741 = vpow2.f32 %v617_v34 }
 0x25c   : > { %v742_v35 = vpop.eup %741 }
 0x25d   : > { %v463_v36 = vadd.f32 1.0, %v742_v35 }
 0x25f   : > { %743 = vrcp.f32 %v463_v36  ;;  %v475_v40 = vand.u32 2147483648, %v463_v36  ;;  %v473_v42 = vand.u32 2147483647, %v463_v36  ;;  %vm469_vm6 = vweird.f32 %v463_v36 }
 0x261   : > { %v476_v44 = vor.u32 1.1754944e-38, %v475_v40  ;;  %vm474_vm8 = vcmp.eq.f32.partialorder %v473_v42, 8.507059e+37 }
 0x265   : > { %v744_v37 = vpop.eup %743 }
 0x266   : > { %v465_v38 = vmul.f32 %v744_v37, %v463_v36  ;;  %vm470_vm5 = vweird.f32 %v744_v37 }
 0x267   : > { %vm471_vm7 = vmor %vm469_vm6, %vm470_vm5 }
 0x268   : > { %v466_v39 = vsub.f32 1.0, %v465_v38 }
 0x26a   : > { %v467_v41 = vmul.f32 %v744_v37, %v466_v39 }
 0x26c   : > { %v468_v43 = vadd.f32 %v744_v37, %v467_v41 }
 0x26e   : > { %v472_v45 = vsel %vm471_vm7, %v744_v37, %v468_v43 }
 0x26f   : > { %v477_v46 = vsel %vm474_vm8, %v476_v44, %v472_v45 }
 0x270   : > { %479 = vst.msk [vmem:[%s332_s13] sm:$0x1] %vm366_vm2, %v477_v46 }
 0x271 PF: > { %s1302_s12 = sld [smem:[#allocation15_spill]]  ;;  %s491_s27 = sshll.u32 %s332_s13, 4  ;;  %s492_s27 = int_to_ptr.vmem [resolvable:$true] %s491_s27 }
 0x272   : > { %s1303_s5 = sld [smem:[#allocation22_spill]]  ;;  %s481_s17 = scalar_lea.sflag [#allocation5], %s1166_s28 }
 0x278   : > { %s489_s6 = scalar_lea.hbm %s1303_s5, %s1302_s12  ;;  %s855_s8 = scalar_lea.hbm %s1303_s5, 2 }
 0x279   : > { %s493_s16 = sshll.u32 %s489_s6, 4  ;;  %s494_s16 = int_to_ptr.hbm [resolvable:$true] %s493_s16 }
 0x27a   : > { %s849_s20 = sshra.s32 %s494_s16, 4  ;;  %s850_s20 = int_to_ptr.hbm [resolvable:$true] %s849_s20 }
 0x27b   : > { %s851_s11 = scalar_lea.hbm %s850_s20, 1  ;;  %p856_p7 = scmp.lt.s32.totalorder %s850_s20, %s1303_s5 }
 0x27c   : > { %p852_p4 = scmp.ne.s32.totalorder %s850_s20, %s851_s11  ;;  %p857_p9 = scmp.lt.s32.totalorder %s855_s8, %s851_s11 }
 0x27e   : > { %p853_p8 = pnand %p852_p4, %p1143_p3  ;;  %p858_p10 = por %p857_p9, %p856_p7 }
 0x280   : > { %p854_p13 = pneg %p853_p8 }
 0x282   : > { %p859_p12 = pnand %p858_p10, %p854_p13 }
 0x284   : > { %862 = shalt.err (!%p859_p12)
}
 0x285   : > { %628 = dma.vmem_to_hbm [thread:$0]  (%p1143_p3), %s492_s27, 16, %s494_s16, %s481_s17  }
 0x286 PF: > { %s1304_s28 = sld [smem:[#allocation14_spill]]  ;;  %p648_p1 = scmp.ge.s32.totalorder %s965_s7, 2 }
 0x288   : > { %p642_p11 = pnand %p648_p1, %p1075_p6 }
 0x28a   : > { %p643_p5 = pneg %p642_p11 }
 0x28c   : > { %s505_s12 = sand.u32 1, %s1304_s28  }
 0x28d   : > { %s506_s9 = scalar_lea.sflag [#allocation5], %s505_s12 }
 0x28e   : > { %920 = dma.done.wait (%p643_p5), %s506_s9, 16  }
 0x28f   : > { %922 = vsyncadd (%p643_p5), %s506_s9, 4294967280  ;;  %s25_s7 = sadd.s32 1, %s965_s7   ;;  %s1306_s14 = sld [smem:[#allocation17_spill]] }
 0x290   : > { %p22_p2 = scmp.ge.s32.totalorder %s25_s7, 6   ;;  %s1307_s6 = sld [smem:[#allocation18_spill]] }
 0x291   : > { %s1308_s21 = smov %s929_s22  ;;  %s1309_s22 = smov %s933_s23 }
 0x292   : > { %s1310_s23 = smov %s1139_s24  ;;  %s1311_s24 = smov %s941_s25 }
 0x293   : > { %s1312_s25 = smov %s945_s26  ;;  %s1313_s26 = smov %s1124_s18 }
 0x294   : > { %s1314_s27 = smov %s957_s29  ;;  %s1315_s28 = smov %s961_s30 }
 0x295   : > { %s1316_s29 = smov %s1306_s14  ;;  %24 = sbr.rel (!%p22_p2) target bundleno = 16 (0x10), region = 117 }
 0x296   : > { %s1317_s30 = smov %s1307_s6 }
 0x29a   :  { %511 = vsyncpa [#allocation4], 1 }
 0x29b   :  { %513 = vsyncpa [#allocation4 + $0x1], 1 }
 0x29c   :  { %514 = vsyncpa [#allocation7], 1 }
 0x29d   :  { %516 = vsyncpa [#allocation7 + $0x1], 1 }
 0x29e   :  { %517 = vsyncpa [#allocation5], 1 }
 0x29f   :  { %519 = vsyncpa [#allocation5 + $0x1], 1 }

</bundles_post_ra>
